<compile_context>
chip_gen: v7x
topology: tpu7x:2x2x1
jax: 0.10.0
libtpu: 0.0.40
codegen_flags: <defaults>
</compile_context>

<pallas_src>
import functools
import math

import jax
import jax.numpy as jnp
import numpy as np
from jax.experimental import pallas as pl
from jax.experimental.pallas import tpu as pltpu


def _round_up(x, m):
    return ((x + m - 1) // m) * m


# ----------------------------- Pallas kernel --------------------------------
def _fused_generator_kernel(x_ref, emb_ref, w1x_ref, w1e_ref, b1_ref,
                            wh_ref, bh_ref, out_ref, h_ref,
                            *, num_layers, b_pad):
    """Grid step = (generator g, head-output tile n).

    x_ref   : [B_pad, hidden_pad]   base input of generator g (zero-padded)
    emb_ref : [L, emb_pad]          layer-embedding table (shared)
    w1x_ref : [hidden_pad, H_pad]   linear1 weight rows for the x part
    w1e_ref : [emb_pad, H_pad]      linear1 weight rows for the embedding part
    b1_ref  : [1, H_pad]
    wh_ref  : [H_pad, tn]           fused heads weight tile (wu|wd|bu|bd, padded)
    bh_ref  : [1, tn]               fused heads bias tile
    out_ref : [L*B_pad, tn]
    h_ref   : VMEM scratch [L*B_pad, H_pad]  (layer-1 activations, reused per n)
    """
    n = pl.program_id(1)

    # Compute the ReLU(linear1) hidden state once per generator (n == 0) and
    # keep it resident across all head-output tiles.
    @pl.when(n == 0)
    def _():
        hb = jnp.dot(x_ref[...], w1x_ref[...],
                     preferred_element_type=jnp.float32) + b1_ref[...]      # [B_pad, H_pad]
        he = jnp.dot(emb_ref[...], w1e_ref[...],
                     preferred_element_type=jnp.float32)                     # [L, H_pad]
        h = jnp.maximum(he[:, None, :] + hb[None, :, :], 0.0)               # [L, B_pad, H_pad]
        h_ref[...] = h.reshape(num_layers * b_pad, h.shape[-1])

    # Single fused, lane-dense head matmul for this output tile.
    out_ref[...] = jnp.dot(h_ref[...], wh_ref[...],
                           preferred_element_type=jnp.float32) + bh_ref[...]


def fused_generator_pallas(x_base, emb, packed, *, num_layers, tn):
    """x_base: [G, B_pad, hidden_pad]; emb: [L, emb_pad]; packed: stacked weights.

    Returns [G, L*B_pad, N_pad] fused head outputs.
    """
    G, b_pad, hidden_pad = x_base.shape
    L, emb_pad = emb.shape
    h_pad = packed["w1x"].shape[2]
    n_pad = packed["wh"].shape[2]
    M = num_layers * b_pad
    n_tiles = n_pad // tn

    kernel = functools.partial(_fused_generator_kernel,
                               num_layers=num_layers, b_pad=b_pad)

    grid_spec = pltpu.PrefetchScalarGridSpec(
        num_scalar_prefetch=0,
        grid=(G, n_tiles),
        in_specs=[
            pl.BlockSpec((None, b_pad, hidden_pad), lambda g, n: (g, 0, 0)),  # x_base[g]
            pl.BlockSpec((L, emb_pad), lambda g, n: (0, 0)),                  # emb (shared)
            pl.BlockSpec((None, hidden_pad, h_pad), lambda g, n: (g, 0, 0)),  # W1_x[g]
            pl.BlockSpec((None, emb_pad, h_pad), lambda g, n: (g, 0, 0)),     # W1_e[g]
            pl.BlockSpec((None, 1, h_pad), lambda g, n: (g, 0, 0)),           # b1[g]
            pl.BlockSpec((None, h_pad, tn), lambda g, n: (g, 0, n)),          # W_heads[g] tile
            pl.BlockSpec((None, 1, tn), lambda g, n: (g, 0, n)),              # b_heads[g] tile
        ],
        out_specs=pl.BlockSpec((None, M, tn), lambda g, n: (g, 0, n)),
        scratch_shapes=[pltpu.VMEM((M, h_pad), jnp.float32)],
    )

    fn = pl.pallas_call(
        kernel,
        out_shape=jax.ShapeDtypeStruct((G, M, n_pad), jnp.float32),
        grid_spec=grid_spec,
        compiler_params=pltpu.CompilerParams(
            dimension_semantics=("parallel", "arbitrary")),
    )
    return fn(x_base, emb, packed["w1x"], packed["w1e"], packed["b1"],
              packed["wh"], packed["bh"])


# --------------------------- parameter creation ------------------------------
def init_simple_generator(key, input_dim, bottleneck, hidden_size, adapter_dim):
    """Deterministic init mirroring SimpleGenerator.__init__ shapes/bounds.

    Weights stored as [in, out] (transposed vs. PyTorch's [out, in])."""
    ks = jax.random.split(key, 6)

    # linear1: PyTorch default init ~ U(-1/sqrt(in), 1/sqrt(in))
    b = 1.0 / math.sqrt(input_dim)
    w1 = jax.random.uniform(ks[0], (input_dim, bottleneck), jnp.float32, -b, b)
    b1 = jax.random.uniform(ks[1], (1, bottleneck), jnp.float32, -b, b)

    # hyperfanin_init_weight(weight_up, bottleneck, adapter_dim)
    bw_up = 0.001 * math.sqrt(3.0 / (bottleneck * adapter_dim))
    wu = jax.random.uniform(ks[2], (bottleneck, hidden_size * adapter_dim),
                            jnp.float32, -bw_up, bw_up)
    bu = jnp.zeros((1, hidden_size * adapter_dim), jnp.float32)

    # hyperfanin_init_weight(weight_down, bottleneck, hidden_size)
    # (fan bound uses hidden_size while the shape is hidden_size*adapter_dim —
    #  this mirrors the PyTorch module exactly.)
    bw_dn = 0.001 * math.sqrt(3.0 / (bottleneck * hidden_size))
    wd = jax.random.uniform(ks[3], (bottleneck, hidden_size * adapter_dim),
                            jnp.float32, -bw_dn, bw_dn)
    bd = jnp.zeros((1, hidden_size * adapter_dim), jnp.float32)

    # hyperfanin_init_bias(bias_up / bias_down, bottleneck)
    bb = 0.001 * math.sqrt(3.0 / bottleneck)
    wbu = jax.random.uniform(ks[4], (bottleneck, hidden_size), jnp.float32, -bb, bb)
    bbu = jnp.zeros((1, hidden_size), jnp.float32)
    wbd = jax.random.uniform(ks[5], (bottleneck, adapter_dim), jnp.float32, -bb, bb)
    bbd = jnp.zeros((1, adapter_dim), jnp.float32)

    return dict(w1=w1, b1=b1, wu=wu, bu=bu, wd=wd, bd=bd,
                wbu=wbu, bbu=bbu, wbd=wbd, bbd=bbd)


def pack_generator_params(params_list, *, hidden, emb_dim, bottleneck,
                          hidden_size, adapter_dim,
                          hidden_pad, emb_pad, h_pad, n_pad):
    """Zero-pad, split linear1, fuse the four heads, stack over generators."""
    n_up = hidden_size * adapter_dim
    w1x, w1e, b1, wh, bh = [], [], [], [], []
    for p in params_list:
        w1 = p["w1"]
        w1x.append(jnp.zeros((hidden_pad, h_pad), jnp.float32)
                   .at[:hidden, :bottleneck].set(w1[:hidden]))
        w1e.append(jnp.zeros((emb_pad, h_pad), jnp.float32)
                   .at[:emb_dim, :bottleneck].set(w1[hidden:]))
        b1.append(jnp.zeros((1, h_pad), jnp.float32)
                  .at[:, :bottleneck].set(p["b1"]))

        w = jnp.zeros((h_pad, n_pad), jnp.float32)
        w = w.at[:bottleneck, 0:n_up].set(p["wu"])
        w = w.at[:bottleneck, n_up:2 * n_up].set(p["wd"])
        w = w.at[:bottleneck, 2 * n_up:2 * n_up + hidden_size].set(p["wbu"])
        w = w.at[:bottleneck,
                 2 * n_up + hidden_size:2 * n_up + hidden_size + adapter_dim].set(p["wbd"])
        wh.append(w)

        b = jnp.zeros((1, n_pad), jnp.float32)
        b = b.at[:, 0:n_up].set(p["bu"])
        b = b.at[:, n_up:2 * n_up].set(p["bd"])
        b = b.at[:, 2 * n_up:2 * n_up + hidden_size].set(p["bbu"])
        b = b.at[:, 2 * n_up + hidden_size:2 * n_up + hidden_size + adapter_dim].set(p["bbd"])
        bh.append(b)

    return dict(w1x=jnp.stack(w1x), w1e=jnp.stack(w1e), b1=jnp.stack(b1),
                wh=jnp.stack(wh), bh=jnp.stack(bh))


# ------------------------ full module forward (wrapper) ----------------------
def parameter_generator_forward(hidden_inputs, other_context_knowledge,
                                layer_embed_table, params_main, params_expert):
    """Equivalent of ParameterGenerator_with_expert_by_scale_shift.forward.

    Returns (layers, layers_other): lists (len = num_hidden_layers) of tuples
    (weight_up, weight_down, bias_up, bias_down) each of shape [B, ...].
    """
    L, emb_dim = layer_embed_table.shape
    B, hidden = hidden_inputs.shape
    bottleneck = params_main["w1"].shape[1]
    hidden_size = params_main["wbu"].shape[1]
    adapter_dim = params_main["wbd"].shape[1]

    # Padded / tiled geometry.
    hidden_pad = _round_up(hidden, 128)
    emb_pad = _round_up(emb_dim, 128)
    h_pad = _round_up(bottleneck, 128)
    b_pad = _round_up(B, 8)
    n_up = hidden_size * adapter_dim
    n_tot = 2 * n_up + hidden_size + adapter_dim
    n128 = _round_up(n_tot, 128)
    tn = min(n128, 1024)                 # head-output tile (keeps v7x VMEM modest)
    n_pad = _round_up(n_tot, tn)

    # Stack + zero-pad the two generators' base inputs (host-side glue).
    def pad_base(x):
        return jnp.zeros((b_pad, hidden_pad), jnp.float32).at[:B, :hidden].set(x)
    x_base = jnp.stack([pad_base(hidden_inputs),
                        pad_base(other_context_knowledge)])            # [2, B_pad, hid_pad]
    emb = jnp.zeros((L, emb_pad), jnp.float32).at[:, :emb_dim].set(layer_embed_table)

    packed = pack_generator_params(
        [params_main, params_expert], hidden=hidden, emb_dim=emb_dim,
        bottleneck=bottleneck, hidden_size=hidden_size, adapter_dim=adapter_dim,
        hidden_pad=hidden_pad, emb_pad=emb_pad, h_pad=h_pad, n_pad=n_pad)

    out = fused_generator_pallas(x_base, emb, packed, num_layers=L, tn=tn)
    out = out.reshape(2, L, b_pad, n_pad)[:, :, :B, :]

    wu = out[..., 0:n_up]
    wd = out[..., n_up:2 * n_up]
    bu = out[..., 2 * n_up:2 * n_up + hidden_size]
    bd = out[..., 2 * n_up + hidden_size:n_tot]

    layers = [(wu[0, i], wd[0, i], bu[0, i], bd[0, i]) for i in range(L)]
    layers_other = [(wu[1, i], wd[1, i], bu[1, i], bd[1, i]) for i in range(L)]
    return layers, layers_other


# ------------------------------ reference (JAX) -------------------------------
def _ref_simple_generator(x, p):
    h = jax.nn.relu(x @ p["w1"] + p["b1"][0])
    return (h @ p["wu"] + p["bu"][0],
            h @ p["wd"] + p["bd"][0],
            h @ p["wbu"] + p["bbu"][0],
            h @ p["wbd"] + p["bbd"][0])


if __name__ == "__main__":
    # Small synthetic config (mirrors the PyTorch module's ctor arguments).
    class Cfg:
        num_hidden_layers = 3
        hidden_size = 32            # config.hidden_size
        hypernetwork_bottleneck = 16
        decoder_adapter_dim = 4
        encoder_adapter_dim = 4

    cfg = Cfg()
    hidden_size_arg = 32            # hidden_size passed to the module ctor
    B = 2
    EMB = 10
    input_dim = cfg.hidden_size + EMB

    key = jax.random.PRNGKey(0)
    k_emb, k_m, k_e, k_x, k_o = jax.random.split(key, 5)

    layer_embed_table = jax.random.normal(k_emb, (cfg.num_hidden_layers, EMB), jnp.float32)
    params_main = init_simple_generator(k_m, input_dim, cfg.hypernetwork_bottleneck,
                                        hidden_size_arg, cfg.decoder_adapter_dim)
    params_expert = init_simple_generator(k_e, input_dim, cfg.hypernetwork_bottleneck,
                                          hidden_size_arg, cfg.decoder_adapter_dim)

    hidden_inputs = jax.random.normal(k_x, (B, cfg.hidden_size), jnp.float32)
    other_context_knowledge = jax.random.normal(k_o, (B, cfg.hidden_size), jnp.float32)

    layers, layers_other = parameter_generator_forward(
        hidden_inputs, other_context_knowledge, layer_embed_table,
        params_main, params_expert)
    jax.block_until_ready(layers)
    jax.block_until_ready(layers_other)

    # Correctness check against a pure-JAX reference of the PyTorch forward.
    for i in range(cfg.num_hidden_layers):
        emb_i = jnp.broadcast_to(layer_embed_table[i][None], (B, EMB))
        x_main = jnp.concatenate([hidden_inputs, emb_i], axis=1)
        x_exp = jnp.concatenate([other_context_knowledge, emb_i], axis=1)
        ref_main = _ref_simple_generator(x_main, params_main)
        ref_exp = _ref_simple_generator(x_exp, params_expert)
        for got, want in zip(layers[i], ref_main):
            np.testing.assert_allclose(np.asarray(got), np.asarray(want),
                                       rtol=1e-5, atol=1e-5)
        for got, want in zip(layers_other[i], ref_exp):
            np.testing.assert_allclose(np.asarray(got), np.asarray(want),
                                       rtol=1e-5, atol=1e-5)

    print("KERNEL_OK")
</pallas_src>

<mosaic_0001>
module attributes {stable_mosaic.version = 11 : i64} {
  func.func @_fused_generator_kernel(%arg0: i32, %arg1: i32, %arg2: memref<1x8x128xf32, #tpu.memory_space<vmem>>, %arg3: memref<3x128xf32, #tpu.memory_space<vmem>>, %arg4: memref<1x128x128xf32, #tpu.memory_space<vmem>>, %arg5: memref<1x128x128xf32, #tpu.memory_space<vmem>>, %arg6: memref<1x1x128xf32, #tpu.memory_space<vmem>>, %arg7: memref<1x128x384xf32, #tpu.memory_space<vmem>>, %arg8: memref<1x1x384xf32, #tpu.memory_space<vmem>>, %arg9: memref<1x24x384xf32, #tpu.memory_space<vmem>>, %arg10: memref<24x128xf32, #tpu.memory_space<vmem>>) attributes {dimension_semantics = [#tpu.dimension_semantics<parallel>, #tpu.dimension_semantics<arbitrary>], iteration_bounds = array<i64: 2, 1>, scalar_prefetch = 0 : i64, scratch_operands = 1 : i64, tpu.core_type = #tpu.core_type<tc>, window_params = [{transform_indices = @transform_0, window_bounds = array<i64: 1, 8, 128>}, {pipeline_mode = #tpu.pipeline_mode<synchronous>, transform_indices = @transform_1, window_bounds = array<i64: 3, 128>}, {transform_indices = @transform_2, window_bounds = array<i64: 1, 128, 128>}, {transform_indices = @transform_3, window_bounds = array<i64: 1, 128, 128>}, {transform_indices = @transform_4, window_bounds = array<i64: 1, 1, 128>}, {transform_indices = @transform_5, window_bounds = array<i64: 1, 128, 384>}, {transform_indices = @transform_6, window_bounds = array<i64: 1, 1, 384>}, {transform_indices = @transform_7, window_bounds = array<i64: 1, 24, 384>}]} {
    %c0_i32 = arith.constant 0 : i32
    %0 = arith.cmpi eq, %arg1, %c0_i32 : i32
    %1 = arith.extui %0 : i1 to i32
    %c0_i32_0 = arith.constant 0 : i32
    %2 = arith.cmpi ne, %1, %c0_i32_0 : i32
    scf.if %2 {
      %c0_11 = arith.constant 0 : index
      %c0_12 = arith.constant 0 : index
      %c0_13 = arith.constant 0 : index
      %14 = vector.load %arg2[%c0_11, %c0_12, %c0_13] : memref<1x8x128xf32, #tpu.memory_space<vmem>>, vector<1x8x128xf32>
      %15 = vector.shape_cast %14 : vector<1x8x128xf32> to vector<8x128xf32>
      %c0_14 = arith.constant 0 : index
      %c0_15 = arith.constant 0 : index
      %c0_16 = arith.constant 0 : index
      %16 = vector.load %arg4[%c0_14, %c0_15, %c0_16] : memref<1x128x128xf32, #tpu.memory_space<vmem>>, vector<1x128x128xf32>
      %17 = vector.shape_cast %16 : vector<1x128x128xf32> to vector<128x128xf32>
      %cst_17 = arith.constant dense<0.000000e+00> : vector<8x128xf32>
      %18 = tpu.matmul %15, %17, %cst_17 {dimension_numbers = #tpu.dot_dimension_numbers<[1], [0], [0], [1], [0, 0, 1, 1], [], []>} : vector<8x128xf32>, vector<128x128xf32>, vector<8x128xf32> -> vector<8x128xf32>
      %c0_18 = arith.constant 0 : index
      %c0_19 = arith.constant 0 : index
      %c0_20 = arith.constant 0 : index
      %19 = vector.load %arg6[%c0_18, %c0_19, %c0_20] : memref<1x1x128xf32, #tpu.memory_space<vmem>>, vector<1x1x128xf32>
      %20 = vector.shape_cast %19 : vector<1x1x128xf32> to vector<1x128xf32>
      %21 = vector.broadcast %20 : vector<1x128xf32> to vector<8x128xf32>
      %22 = arith.addf %18, %21 : vector<8x128xf32>
      %c0_21 = arith.constant 0 : index
      %c0_22 = arith.constant 0 : index
      %23 = vector.load %arg3[%c0_21, %c0_22] : memref<3x128xf32, #tpu.memory_space<vmem>>, vector<3x128xf32>
      %c0_23 = arith.constant 0 : index
      %c0_24 = arith.constant 0 : index
      %c0_25 = arith.constant 0 : index
      %24 = vector.load %arg5[%c0_23, %c0_24, %c0_25] : memref<1x128x128xf32, #tpu.memory_space<vmem>>, vector<1x128x128xf32>
      %25 = vector.shape_cast %24 : vector<1x128x128xf32> to vector<128x128xf32>
      %cst_26 = arith.constant dense<0.000000e+00> : vector<3x128xf32>
      %26 = tpu.matmul %23, %25, %cst_26 {dimension_numbers = #tpu.dot_dimension_numbers<[1], [0], [0], [1], [0, 0, 1, 1], [], []>} : vector<3x128xf32>, vector<128x128xf32>, vector<3x128xf32> -> vector<3x128xf32>
      %27 = vector.shape_cast %26 : vector<3x128xf32> to vector<3x1x128xf32>
      %28 = vector.shape_cast %22 : vector<8x128xf32> to vector<1x8x128xf32>
      %29 = vector.broadcast %27 : vector<3x1x128xf32> to vector<3x8x128xf32>
      %30 = vector.broadcast %28 : vector<1x8x128xf32> to vector<3x8x128xf32>
      %31 = arith.addf %29, %30 : vector<3x8x128xf32>
      %cst_27 = arith.constant 0.000000e+00 : f32
      %32 = vector.broadcast %cst_27 : f32 to vector<3x8x128xf32>
      %33 = arith.maximumf %31, %32 : vector<3x8x128xf32>
      %34 = vector.shape_cast %33 : vector<3x8x128xf32> to vector<24x128xf32>
      %c0_28 = arith.constant 0 : index
      %c0_29 = arith.constant 0 : index
      %35 = vector.load %arg10[%c0_28, %c0_29] : memref<24x128xf32, #tpu.memory_space<vmem>>, vector<24x128xf32>
      tpu.vector_store %arg10[%c0_28, %c0_29], %34 {strides = array<i32>} : memref<24x128xf32, #tpu.memory_space<vmem>>, vector<24x128xf32>,
    } else {
    }
    %c0 = arith.constant 0 : index
    %c0_1 = arith.constant 0 : index
    %3 = vector.load %arg10[%c0, %c0_1] : memref<24x128xf32, #tpu.memory_space<vmem>>, vector<24x128xf32>
    %c0_2 = arith.constant 0 : index
    %c0_3 = arith.constant 0 : index
    %c0_4 = arith.constant 0 : index
    %4 = vector.load %arg7[%c0_2, %c0_3, %c0_4] : memref<1x128x384xf32, #tpu.memory_space<vmem>>, vector<1x128x384xf32>
    %5 = vector.shape_cast %4 : vector<1x128x384xf32> to vector<128x384xf32>
    %cst = arith.constant dense<0.000000e+00> : vector<24x384xf32>
    %6 = tpu.matmul %3, %5, %cst {dimension_numbers = #tpu.dot_dimension_numbers<[1], [0], [0], [1], [0, 0, 1, 1], [], []>} : vector<24x128xf32>, vector<128x384xf32>, vector<24x384xf32> -> vector<24x384xf32>
    %c0_5 = arith.constant 0 : index
    %c0_6 = arith.constant 0 : index
    %c0_7 = arith.constant 0 : index
    %7 = vector.load %arg8[%c0_5, %c0_6, %c0_7] : memref<1x1x384xf32, #tpu.memory_space<vmem>>, vector<1x1x384xf32>
    %8 = vector.shape_cast %7 : vector<1x1x384xf32> to vector<1x384xf32>
    %9 = vector.broadcast %8 : vector<1x384xf32> to vector<24x384xf32>
    %10 = arith.addf %6, %9 : vector<24x384xf32>
    %c0_8 = arith.constant 0 : index
    %c0_9 = arith.constant 0 : index
    %c0_10 = arith.constant 0 : index
    %11 = vector.load %arg9[%c0_8, %c0_9, %c0_10] : memref<1x24x384xf32, #tpu.memory_space<vmem>>, vector<1x24x384xf32>
    %12 = vector.shape_cast %11 : vector<1x24x384xf32> to vector<24x384xf32>
    %13 = vector.shape_cast %10 : vector<24x384xf32> to vector<1x24x384xf32>
    tpu.vector_store %arg9[%c0_8, %c0_9, %c0_10], %13 {strides = array<i32>} : memref<1x24x384xf32, #tpu.memory_space<vmem>>, vector<1x24x384xf32>,
    return
  }
  func.func @transform_0(%arg0: i32, %arg1: i32) -> (i32, i32, i32) {
    %c0_i32 = arith.constant 0 : i32
    %c0_i32_0 = arith.constant 0 : i32
    %c0_i32_1 = arith.constant 0 : i32
    return %arg0, %c0_i32, %c0_i32_0 : i32, i32, i32
  }
  func.func @transform_1(%arg0: i32, %arg1: i32) -> (i32, i32) {
    %c0_i32 = arith.constant 0 : i32
    %c0_i32_0 = arith.constant 0 : i32
    %c0_i32_1 = arith.constant 0 : i32
    return %c0_i32, %c0_i32_0 : i32, i32
  }
  func.func @transform_2(%arg0: i32, %arg1: i32) -> (i32, i32, i32) {
    %c0_i32 = arith.constant 0 : i32
    %c0_i32_0 = arith.constant 0 : i32
    %c0_i32_1 = arith.constant 0 : i32
    return %arg0, %c0_i32, %c0_i32_0 : i32, i32, i32
  }
  func.func @transform_3(%arg0: i32, %arg1: i32) -> (i32, i32, i32) {
    %c0_i32 = arith.constant 0 : i32
    %c0_i32_0 = arith.constant 0 : i32
    %c0_i32_1 = arith.constant 0 : i32
    return %arg0, %c0_i32, %c0_i32_0 : i32, i32, i32
  }
  func.func @transform_4(%arg0: i32, %arg1: i32) -> (i32, i32, i32) {
    %c0_i32 = arith.constant 0 : i32
    %c0_i32_0 = arith.constant 0 : i32
    %c0_i32_1 = arith.constant 0 : i32
    return %arg0, %c0_i32, %c0_i32_0 : i32, i32, i32
  }
  func.func @transform_5(%arg0: i32, %arg1: i32) -> (i32, i32, i32) {
    %c0_i32 = arith.constant 0 : i32
    %c0_i32_0 = arith.constant 0 : i32
    return %arg0, %c0_i32, %arg1 : i32, i32, i32
  }
  func.func @transform_6(%arg0: i32, %arg1: i32) -> (i32, i32, i32) {
    %c0_i32 = arith.constant 0 : i32
    %c0_i32_0 = arith.constant 0 : i32
    return %arg0, %c0_i32, %arg1 : i32, i32, i32
  }
  func.func @transform_7(%arg0: i32, %arg1: i32) -> (i32, i32, i32) {
    %c0_i32 = arith.constant 0 : i32
    %c0_i32_0 = arith.constant 0 : i32
    return %arg0, %c0_i32, %arg1 : i32, i32, i32
  }
}

</mosaic_0001>

<bundles_post_ra>
// kernel: tpu_custom_call.1
= control target key start
LH: loop header
LB: loop body
LE: loop exit
PB: predicated region body
PF: predicated region fallthrough
CT: control target
= control target key end

     0   :  { %s2325_s0 = inlined_call_operand.hbm [shape: f32[2,8,128], index: 0, kind: input, shape index: {}]   ;;  %s2326_s1 = inlined_call_operand.hbm [shape: f32[3,128], index: 1, kind: input, shape index: {}]   ;;  %s2327_s2 = inlined_call_operand.hbm [shape: f32[2,128,128], index: 2, kind: input, shape index: {}]   ;;  %s2328_s3 = inlined_call_operand.hbm [shape: f32[2,128,128], index: 3, kind: input, shape index: {}]   ;;  %s2329_s4 = inlined_call_operand.vmem [shape: f32[2,1,128], index: 4, kind: input, shape index: {}]   ;;  %s2330_s5 = inlined_call_operand.hbm [shape: f32[2,128,384], index: 5, kind: input, shape index: {}]   ;;  %s2331_s6 = inlined_call_operand.vmem [shape: f32[2,1,384], index: 6, kind: input, shape index: {}]   ;;  %s2332_s7 = inlined_call_operand.hbm [shape: f32[2,24,384], index: 7, kind: output, shape index: {}]  }
   0x1   :  { %2341 = sst [smem:[#allocation18_spill]] %s2325_s0 }
   0x2   :  { %2342 = sst [smem:[#allocation19_spill]] %s2327_s2 }
   0x3   :  { %2343 = sst [smem:[#allocation20_spill]] %s2328_s3 }
   0x4   :  { %2344 = sst [smem:[#allocation21_spill]] %s2332_s7 }
   0x5   :  { %12 = vsyncpa [#allocation4], 0 }
   0x6   :  { %14 = vsyncpa [#allocation4 + $0x1], 0 }
   0x7   :  { %15 = vsyncpa [#allocation7], 0 }
   0x8   :  { %16 = vsyncpa [#allocation5], 0 }
   0x9   :  { %18 = vsyncpa [#allocation5 + $0x1], 0  ;;  %s1848_s24 = smov 0   ;;  %s1850_s25 = smov 0  }
   0xa   :  { %s1852_s26 = smov 0   ;;  %s1854_s27 = smov 0  }
   0xb   :  { %s1856_s28 = smov 0   ;;  %s1858_s29 = smov 0  }
   0xc LB: > { %s36_s30 = sadd.s32 1, %s1786_s28  ;;  %s43_s8 = sadd.s32 1, %s1778_s26  ;;  %s1790_s29 = sphi %s1858_s29, %s24_s29   ;;  %s1786_s28 = sphi %s1856_s28, %s2374_s28   ;;  %s1782_s27 = sphi %s1854_s27, %s2373_s27   ;;  %s1778_s26 = sphi %s1852_s26, %s2372_s26   ;;  %s1774_s25 = sphi %s1850_s25, %s2371_s25   ;;  %s1770_s24 = sphi %s1848_s24, %s2370_s24  }
   0xd   : > { %p38_p0 = scmp.ge.s32.totalorder %s36_s30, 2  ;;  %p2333_p1 = scmp.ne.s32.totalorder %s1778_s26, %s1774_s25 }
   0xe   : > { %p51_p2 = scmp.eq.s32.totalorder %s1790_s29, 0  ;;  %p1490_p5 = scmp.lt.s32.totalorder %s1790_s29, 2 }
   0xf   : > { %s2376_s30 = smov (%p38_p0, %s36_s30), 0  ;;  %s274_s10 = sand.u32 1, %s1790_s29  }
  0x10   : > { %2345 = sst [smem:[#allocation16_spill]] %s2376_s30  ;;  %p52_p4 = por %p51_p2, %p2333_p1 }
  0x11   : > { %s40_s9 = ssub.s32 %s1786_s28, %s2376_s30  ;;  %s1894_s11 = sand.u32 1, %s1778_s26  }
  0x12   : > { %p41_p6 = scmp.eq.s32.totalorder %s40_s9, 0  ;;  %s1161_s12 = sshll.u32 %s1786_s28, 7 }
  0x13   : > { %s1160_s14 = sshll.u32 %s1894_s11, 3  ;;  %s2347_s0 = sld [smem:[#allocation18_spill]] }
  0x14   : > { %s1898_s13 = scalar_select %p41_p6, %s1778_s26, %s43_s8  }
  0x15   : > { %p1906_p7 = pnand %p1490_p5, %p52_p4  ;;  %s278_s19 = scalar_lea.vmem [#allocation3], %s1160_s14 }
  0x16   : > { %2346 = sst [smem:[#allocation17_spill]] %s1898_s13  ;;  %s285_s20 = sshll.u32 %s278_s19, 4  ;;  %s1911_s20 = int_to_ptr.vmem [resolvable:$true] %s285_s20 }
  0x17   : > { %s1162_s21 = sshll.u32 %s1894_s11, 7  ;;  %s1913_s22 = scalar_lea.sflag [#allocation4], %s274_s10 }
  0x18   : > { %p1919_p9 = pneg %p1906_p7 }
  0x19   : > { %s1904_s17 = scalar_lea.hbm %s2347_s0, %s1161_s12  ;;  %s1557_s14 = scalar_lea.hbm %s2347_s0, 256 }
  0x1a   : > { %s1552_s23 = scalar_lea.hbm %s1904_s17, 128  ;;  %p1558_p12 = scmp.lt.u32.totalorder %s1904_s17, %s2347_s0 }
  0x1b   : > { %p1553_p8 = scmp.ne.s32.totalorder %s1904_s17, %s1552_s23  ;;  %p1559_p13 = scmp.lt.u32.totalorder %s1557_s14, %s1552_s23 }
  0x1c   : > { %p1561_p2 = scmp.lt.u32.totalorder %s1552_s23, %s1904_s17 }
  0x1d   : > { %p1555_p10 = pnand %p1919_p9, %p1553_p8  ;;  %p1560_p0 = por %p1559_p13, %p1558_p12 }
  0x1f   : > { %p1556_p11 = pneg %p1555_p10  ;;  %p1562_p4 = por %p1561_p2, %p1560_p0 }
  0x21   : > { %p1563_p5 = pnand %p1562_p4, %p1556_p11 }
  0x23   : > { %1566 = shalt.err (!%p1563_p5)
}
  0x24   : > { %s1567_s10 = scalar_lea.vmem %s1911_s20, 128  ;;  %s1792_s19 = smov [#allocation3]  }
  0x25   : > { %p1568_p6 = scmp.ne.s32.totalorder %s1911_s20, %s1567_s10  ;;  %s1572_s9 = sshll.u32 %s1792_s19, 4  ;;  %s1573_s9 = int_to_ptr.vmem [resolvable:$false] %s1572_s9 }
  0x26   : > { %s1574_s12 = scalar_lea.vmem %s1573_s9, 256  ;;  %p1575_p3 = scmp.lt.s32.totalorder %s1911_s20, %s1573_s9 }
  0x27   : > { %p1570_p8 = pnand %p1568_p6, %p1919_p9  ;;  %p1576_p1 = scmp.lt.s32.totalorder %s1574_s12, %s1567_s10 }
  0x29   : > { %p1571_p10 = pneg %p1570_p8  ;;  %p1577_p12 = por %p1576_p1, %p1575_p3 }
  0x2b   : > { %p1578_p13 = pnand %p1577_p12, %p1571_p10 }
  0x2d   : > { %1581 = shalt.err (!%p1578_p13)
}
  0x2e   : > { %1475 = dma.hbm_to_vmem [thread:$0]  (!%p1906_p7), %s1904_s17, 128, %s1911_s20, %s1913_s22  }
  0x2f   : > { %s296_s23 = scalar_lea.vmem [#allocation8], %s1162_s21  ;;  %s317_s15 = scalar_lea.vmem [#allocation9], %s1162_s21 }
  0x30   : > { %s303_s14 = sshll.u32 %s296_s23, 4  ;;  %s324_s16 = sshll.u32 %s317_s15, 4  ;;  %s1945_s14 = int_to_ptr.vmem [resolvable:$true] %s303_s14  ;;  %s1956_s16 = int_to_ptr.vmem [resolvable:$true] %s324_s16 }
  0x31   : > { %s1448_s10 = smul.u32 384, %s1894_s11  ;;  %s1178_s19 = sshll.u32 %s1786_s28, 11 }
  0x32   : > { %s2350_s2 = sld [smem:[#allocation19_spill]]  ;;  %s2351_s3 = sld [smem:[#allocation20_spill]] }
  0x33   : > { %s1963_s21 = scalar_lea.vmem [#allocation10], %s1448_s10 }
  0x34   : > { %s353_s11 = sshll.u32 %s1963_s21, 4  ;;  %s2045_s11 = int_to_ptr.vmem [resolvable:$true] %s353_s11 }
  0x38   : > { %s1954_s0 = scalar_lea.hbm %s2350_s2, %s1178_s19  ;;  %s1961_s23 = scalar_lea.hbm %s2351_s3, %s1178_s19 }
  0x39   : > { %s1582_s15 = scalar_lea.hbm %s1954_s0, 2048  ;;  %s1587_s30 = scalar_lea.hbm %s2350_s2, 4096 }
  0x3a   : > { %p1583_p1 = scmp.ne.s32.totalorder %s1954_s0, %s1582_s15  ;;  %p1588_p0 = scmp.lt.u32.totalorder %s1954_s0, %s2350_s2 }
  0x3b   : > { %p1589_p2 = scmp.lt.u32.totalorder %s1587_s30, %s1582_s15  ;;  %p1591_p5 = scmp.lt.u32.totalorder %s1582_s15, %s1954_s0 }
  0x3c   : > { %p1585_p3 = pnand %p1583_p1, %p1919_p9 }
  0x3d   : > { %p1590_p4 = por %p1589_p2, %p1588_p0 }
  0x3e   : > { %p1586_p11 = pneg %p1585_p3 }
  0x3f   : > { %p1592_p6 = por %p1591_p5, %p1590_p4 }
  0x41   : > { %p1593_p8 = pnand %p1592_p6, %p1586_p11 }
  0x43   : > { %1596 = shalt.err (!%p1593_p8)
}
  0x44   : > { %s1597_s10 = scalar_lea.vmem %s1945_s14, 2048  ;;  %s1793_s19 = smov [#allocation8]  }
  0x45   : > { %p1598_p10 = scmp.ne.s32.totalorder %s1945_s14, %s1597_s10  ;;  %s1602_s17 = sshll.u32 %s1793_s19, 4  ;;  %s1603_s17 = int_to_ptr.vmem [resolvable:$false] %s1602_s17 }
  0x46   : > { %s1604_s7 = scalar_lea.vmem %s1603_s17, 4096  ;;  %p1605_p1 = scmp.lt.s32.totalorder %s1945_s14, %s1603_s17 }
  0x47   : > { %p1600_p12 = pnand %p1598_p10, %p1919_p9  ;;  %p1606_p3 = scmp.lt.s32.totalorder %s1604_s7, %s1597_s10 }
  0x49   : > { %p1601_p13 = pneg %p1600_p12  ;;  %p1607_p0 = por %p1606_p3, %p1605_p1 }
  0x4b   : > { %p1608_p2 = pnand %p1607_p0, %p1601_p13 }
  0x4d   : > { %1611 = shalt.err (!%p1608_p2)
}
  0x4e   : > { %s1794_s30 = smov 128   ;;  %s1795_s13 = smov 8  }
  0x4f   : > { %1478 = dma.hbm_to_vmem [thread:$0]  (!%p1906_p7), %s1954_s0, 2048, %s1945_s14, %s1913_s22, %s1794_s30, %s1794_s30, %s1795_s13  }
  0x50   : > { %s1612_s20 = scalar_lea.hbm %s1961_s23, 2048  ;;  %s1617_s12 = scalar_lea.hbm %s2351_s3, 4096 }
  0x51   : > { %p1613_p11 = scmp.ne.s32.totalorder %s1961_s23, %s1612_s20  ;;  %p1618_p6 = scmp.lt.u32.totalorder %s1961_s23, %s2351_s3 }
  0x52   : > { %p1619_p8 = scmp.lt.u32.totalorder %s1617_s12, %s1612_s20  ;;  %p1621_p12 = scmp.lt.u32.totalorder %s1612_s20, %s1961_s23 }
  0x53   : > { %p1615_p4 = pnand %p1613_p11, %p1919_p9 }
  0x54   : > { %p1620_p10 = por %p1619_p8, %p1618_p6 }
  0x55   : > { %p1616_p5 = pneg %p1615_p4 }
  0x56   : > { %p1622_p13 = por %p1621_p12, %p1620_p10 }
  0x58   : > { %p1623_p1 = pnand %p1622_p13, %p1616_p5 }
  0x5a   : > { %1626 = shalt.err (!%p1623_p1)
}
  0x5b   : > { %s1627_s0 = scalar_lea.vmem %s1956_s16, 2048  ;;  %s1796_s14 = smov [#allocation9]  }
  0x5c   : > { %p1628_p3 = scmp.ne.s32.totalorder %s1956_s16, %s1627_s0  ;;  %s1632_s17 = sshll.u32 %s1796_s14, 4  ;;  %s1633_s17 = int_to_ptr.vmem [resolvable:$false] %s1632_s17 }
  0x5d   : > { %s1634_s7 = scalar_lea.vmem %s1633_s17, 4096  ;;  %p1635_p11 = scmp.lt.s32.totalorder %s1956_s16, %s1633_s17 }
  0x5e   : > { %p1630_p0 = pnand %p1628_p3, %p1919_p9  ;;  %p1636_p4 = scmp.lt.s32.totalorder %s1634_s7, %s1627_s0 }
  0x60   : > { %p1631_p2 = pneg %p1630_p0  ;;  %p1637_p6 = por %p1636_p4, %p1635_p11 }
  0x62   : > { %p1638_p8 = pnand %p1637_p6, %p1631_p2 }
  0x64   : > { %1641 = shalt.err (!%p1638_p8)
}
  0x65   : > { %1481 = dma.hbm_to_vmem [thread:$0]  (!%p1906_p7), %s1961_s23, 2048, %s1956_s16, %s1913_s22, %s1794_s30, %s1794_s30, %s1795_s13  }
  0x66   : > { %s2017_s20 = sadd.s32 4294967295, %s1790_s29   ;;  %s1156_s15 = sadd.s32 4294967294, %s1790_s29  }
  0x67   : > { %p56_p5 = scmp.ne.s32.totalorder %s1774_s25, %s1770_s24  ;;  %p2337_p10 = scmp.eq.s32.totalorder %s2017_s20, 0 }
  0x68   : > { %p237_p12 = scmp.eq.s32.totalorder %s2017_s20, 1  ;;  %p243_p13 = scmp.eq.s32.totalorder %s1156_s15, 1 }
  0x69   : > { %p1157_p1 = scmp.ge.s32.totalorder %s1790_s29, 1  ;;  %p2027_p3 = por %p2337_p10, %p56_p5 }
  0x6a   : > { %p2353_p0 = scmp.ne.s32.totalorder %s1778_s26, %s1774_s25  ;;  %p2038_p11 = por %p243_p13, %p56_p5 }
  0x6b   : > { %s2352_s9 = scalar_select %p2027_p3, 1, 0 }
  0x6c   : > { %p2034_p2 = por %p237_p12, %p2353_p0  ;;  %p250_p4 = scmp.lt.s32.totalorder %s1790_s29, 3 }
  0x6d   : > { %s2355_s23 = scalar_select %p2038_p11, 1, 0 }
  0x6e   : > { %s2354_s16 = scalar_select %p2034_p2, 1, 0 }
  0x6f   : > { %p2047_p6 = pnand %p1157_p1, %p250_p4  ;;  %s1797_s13 = smov [#allocation6]  }
  0x70   : > { %s263_s12 = sshll.u32 %s1797_s13, 4  ;;  %s1449_s10 = smul.u32 6144, %s1786_s28  ;;  %s2059_s12 = int_to_ptr.vmem [resolvable:$true] %s263_s12 }
  0x71   : > { %s2356_s30 = scalar_select %p2047_p6, 1, 0 }
  0x72   : > { %p1468_p8 = pneg %p2047_p6  ;;  %s2057_s14 = scalar_lea.hbm %s2330_s5, %s1449_s10 }
  0x73   : > { %s1642_s17 = scalar_lea.hbm %s2057_s14, 6144  ;;  %s1647_s13 = scalar_lea.hbm %s2330_s5, 12288 }
  0x74   : > { %p2063_p5 = pnand %p1468_p8, %p2337_p10  ;;  %p1643_p12 = scmp.ne.s32.totalorder %s2057_s14, %s1642_s17 }
  0x75   : > { %p1648_p0 = scmp.lt.u32.totalorder %s2057_s14, %s2330_s5  ;;  %p1649_p4 = scmp.lt.u32.totalorder %s1647_s13, %s1642_s17 }
  0x76   : > { %s2357_s21 = scalar_select %p2063_p5, 1, 0 }
  0x77   : > { %p1645_p13 = pnand %p1643_p12, %p1919_p9  ;;  %p1650_p11 = por %p1649_p4, %p1648_p0 }
  0x78   : > { %p1651_p2 = scmp.lt.u32.totalorder %s1642_s17, %s2057_s14 }
  0x79   : > { %p1646_p1 = pneg %p1645_p13 }
  0x7a   : > { %p1652_p8 = por %p1651_p2, %p1650_p11 }
  0x7c   : > { %p1653_p10 = pnand %p1652_p8, %p1646_p1 }
  0x7e   : > { %1656 = shalt.err (!%p1653_p10)
}
  0x7f   : > { %s1657_s0 = scalar_lea.vmem %s2045_s11, 6144  ;;  %s1798_s7 = smov [#allocation10]  }
  0x80   : > { %p1658_p12 = scmp.ne.s32.totalorder %s2045_s11, %s1657_s0  ;;  %s1662_s15 = sshll.u32 %s1798_s7, 4  ;;  %s1663_s15 = int_to_ptr.vmem [resolvable:$false] %s1662_s15 }
  0x81   : > { %s1664_s10 = scalar_lea.vmem %s1663_s15, 12288  ;;  %p1665_p6 = scmp.lt.s32.totalorder %s2045_s11, %s1663_s15 }
  0x82   : > { %p1660_p13 = pnand %p1658_p12, %p1919_p9  ;;  %p1666_p5 = scmp.lt.s32.totalorder %s1664_s10, %s1657_s0 }
  0x84   : > { %p1661_p3 = pneg %p1660_p13  ;;  %p1667_p0 = por %p1666_p5, %p1665_p6 }
  0x86   : > { %p1668_p4 = pnand %p1667_p0, %p1661_p3 }
  0x88   : > { %1671 = shalt.err (!%p1668_p4)
}
  0x89   : > { %s1799_s17 = smov 384   ;;  %s1800_s13 = smov 24  }
  0x8a   : > { %1484 = dma.hbm_to_vmem [thread:$0]  (!%p1906_p7), %s2057_s14, 6144, %s2045_s11, %s1913_s22, %s1799_s17, %s1799_s17, %s1800_s13  }
  0x8b   : > { %s1672_s7 = scalar_lea.hbm %s2326_s1, 64  ;;  %p2358_p10 = scmp.ne.s32.totalorder %s2357_s21, 0 }
  0x8c   : > { %p1673_p9 = scmp.ne.s32.totalorder %s2326_s1, %s1672_s7  ;;  %p1679_p6 = scmp.lt.u32.totalorder %s1672_s7, %s2326_s1 }
  0x8d   : > { %p1674_p3 = pneg %p2358_p10 }
  0x8f   : > { %p1675_p2 = pnand %p1674_p3, %p1673_p9 }
  0x91   : > { %p1676_p11 = pneg %p1675_p2 }
  0x93   : > { %p1681_p5 = pnand %p1679_p6, %p1676_p11 }
  0x95   : > { %1684 = shalt.err (!%p1681_p5)
}
  0x96   : > { %s1685_s18 = scalar_lea.vmem %s2059_s12, 64  ;;  %p1693_p12 = scmp.lt.s32.totalorder %s2059_s12, %s2059_s12 }
  0x97   : > { %p1686_p7 = scmp.ne.s32.totalorder %s2059_s12, %s1685_s18  ;;  %p1694_p13 = scmp.lt.s32.totalorder %s1685_s18, %s1685_s18 }
  0x99   : > { %p1688_p1 = pnand %p1686_p7, %p1674_p3  ;;  %p1695_p0 = por %p1694_p13, %p1693_p12 }
  0x9b   : > { %p1689_p8 = pneg %p1688_p1 }
  0x9d   : > { %p1696_p4 = pnand %p1695_p0, %p1689_p8 }
  0x9f   : > { %1699 = shalt.err (!%p1696_p4)
}
  0xa0   : > { %1471 = dma.hbm_to_vmem [thread:$0]  (!%p2358_p10), %s2326_s1, 64, %s2059_s12, [#allocation7]  }
  0xa1   : > { %p2359_p9 = scmp.ne.s32.totalorder %s2356_s30, 0 }
  0xa2   : > { %s379_s22 = sand.u32 (!%p2359_p9), 1, %s2017_s20   ;;  %s2114_s11 = sand.u32 (!%p2359_p9), 1, %s1774_s25  }
  0xa3   : > { %377 = sbr.rel (%p2359_p9) target bundleno = 672 (0x2a0), region = 48  ;;  %s1170_s14 = sshll.u32 (!%p2359_p9), %s2114_s11, 3 }
  0xa4   : > { %s380_s10 = scalar_lea.sflag (!%p2359_p9), [#allocation4], %s379_s22  ;;  %s2117_s17 = scalar_lea.vmem (!%p2359_p9), [#allocation3], %s1170_s14 }
  0xa5   : > { %p2360_p3 = scmp.ne.s32.totalorder (!%p2359_p9), %s2352_s9, 0 }
  0xaa   : > { %1753 = dma.done.wait (%p2360_p3), %s380_s10, 128  }
  0xab   : > { %1755 = vsyncadd (%p2360_p3), %s380_s10, 4294967168  ;;  %p2361_p10 = scmp.eq.s32.totalorder %s2017_s20, 0 }
  0xad   : > { %1757 = dma.done.wait (%p2361_p10), [#allocation7], 64   ;;  %p2362_p2 = pmov %p2361_p10 }
  0xae   : > { %s1172_s30 = sshll.u32 %s2114_s11, 7 }
  0xaf   : > { %1759 = vsyncadd (%p2362_p2), [#allocation7], 4294967232  ;;  %s2128_s12 = scalar_lea.vmem [#allocation8], %s1172_s30 }
  0xb0   : > { %1761 = dma.done.wait (%p2360_p3), %s380_s10, 10240  }
  0xb1   : > { %1763 = vsyncadd (%p2360_p3), %s380_s10, 4294957056  ;;  %v1801_v0 = vmov 0.0|0.0   ;;  %vm1802_vm0 = vmmov 0   ;;  %v1803_v1 = vmov 0.0   ;;  %s2140_s20 = scalar_lea.vmem [#allocation9], %s1172_s30  ;;  %v490_v4 = vld [vmem:[%s2128_s12] sm:$0xff] }
  0xb2   : > { %1368 = vmatprep.subr.bf16.mxu1 %v1801_v0  ;;  %1344 = vmatprep.subr.bf16.mxu0 %v1801_v0  ;;  %v584_v2 = vld [vmem:[%s2140_s20] sm:$0xff]  ;;  %v585_v3 = vld [vmem:[%s2140_s20 + $0x8] sm:$0xff]  ;;  %v586_v7 = vld [vmem:[%s2140_s20 + $0x10] sm:$0xff]  ;;  %s1450_s9 = smul.u32 384, %s2114_s11  ;;  %p471_p11 = scmp.lt.s32.totalorder %s1782_s27, 1 }
  0xb3   : > { %1300 = vmatprep.mubr.msk.f32.mxu1 %vm1802_vm0, %v1803_v1  ;;  %1265 = vmatprep.mubr.msk.f32.mxu0 %vm1802_vm0, %v1803_v1  ;;  %v1369_v5 = vpack.c.bf16 %v585_v3, %v584_v2  ;;  %v491_v6 = vld [vmem:[%s2128_s12 + $0x8] sm:$0xff]  ;;  %v587_v8 = vld [vmem:[%s2140_s20 + $0x18] sm:$0xff]  ;;  %v492_v10 = vld [vmem:[%s2128_s12 + $0x10] sm:$0xff]  ;;  %s1451_s3 = smul.u32 72, %s2114_s11  ;;  %p2365_p5 = scmp.ne.s32.totalorder %s2354_s16, 0 }
  0xb4   : > { %v1345_v9 = vpack.c.bf16 %v491_v6, %v490_v4  ;;  %v493_v11 = vld [vmem:[%s2128_s12 + $0x18] sm:$0xff]  ;;  %v1372_v12 = vpack.c.bf16 %v587_v8, %v586_v7  ;;  %v588_v14 = vld [vmem:[%s2140_s20 + $0x20] sm:$0xff]  ;;  %v589_v15 = vld [vmem:[%s2140_s20 + $0x28] sm:$0xff]  ;;  %s2187_s21 = scalar_lea.vmem [#allocation10], %s1450_s9  ;;  %s1453_s10 = smul.u32 1152, %s1782_s27 }
  0xb5   : > { %1370 = vmatpush3.bf16.msra.mxu1 %v1369_v5  ;;  %v1348_v13 = vpack.c.bf16 %v493_v11, %v492_v10  ;;  %v494_v16 = vld [vmem:[%s2128_s12 + $0x20] sm:$0xff]  ;;  %v495_v17 = vld [vmem:[%s2128_s12 + $0x28] sm:$0xff]  ;;  %v1375_v18 = vpack.c.bf16 %v589_v15, %v588_v14  ;;  %v590_v20 = vld [vmem:[%s2140_s20 + $0x30] sm:$0xff]  ;;  %s2253_s13 = scalar_select %p471_p11, %s1782_s27, 1 }
  0xb6   : > { %1346 = vmatpush3.bf16.msra.mxu0 %v1345_v9  ;;  %1371 = vmatprep.subr.bf16.mxu1 %v1801_v0  ;;  %v1351_v19 = vpack.c.bf16 %v495_v17, %v494_v16  ;;  %v591_v21 = vld [vmem:[%s2140_s20 + $0x38] sm:$0xff]  ;;  %v496_v22 = vld [vmem:[%s2128_s12 + $0x30] sm:$0xff]  ;;  %v592_v26 = vld [vmem:[%s2140_s20 + $0x40] sm:$0xff]  ;;  %s470_s22 = scalar_lea.vmem [#allocation11], %s1451_s3  ;;  %s2363_s27 = sld [smem:[#allocation21_spill]] }
  0xb7   : > { %1347 = vmatprep.subr.bf16.mxu0 %v1801_v0  ;;  %v497_v23 = vld [vmem:[%s2128_s12 + $0x38] sm:$0xff]  ;;  %v1378_v24 = vpack.c.bf16 %v591_v21, %v590_v20  ;;  %v593_v27 = vld [vmem:[%s2140_s20 + $0x48] sm:$0xff]  ;;  %v498_v28 = vld [vmem:[%s2128_s12 + $0x40] sm:$0xff]  ;;  %s473_s7 = scalar_lea.vmem %s2329_s4, %s2253_s13  ;;  %s1452_s0 = smul.u32 3, %s2253_s13 }
  0xb8   : > { %v1354_v25 = vpack.c.bf16 %v497_v23, %v496_v22  ;;  %v499_v29 = vld [vmem:[%s2128_s12 + $0x48] sm:$0xff]  ;;  %v1381_v30 = vpack.c.bf16 %v593_v27, %v592_v26  ;;  %v594_v32 = vld [vmem:[%s2140_s20 + $0x50] sm:$0xff]  ;;  %v595_v33 = vld [vmem:[%s2140_s20 + $0x58] sm:$0xff]  ;;  %s974_s14 = sshll.u32 %s470_s22, 4  ;;  %s959_s9 = scalar_lea.sflag [#allocation5], %s2114_s11  ;;  %s2271_s14 = int_to_ptr.vmem [resolvable:$true] %s974_s14 }
  0xb9   : > { %1373 = vmatpush3.bf16.msra.mxu1 %v1372_v12  ;;  %v1357_v31 = vpack.c.bf16 %v499_v29, %v498_v28  ;;  %v500_v34 = vld [vmem:[%s2128_s12 + $0x50] sm:$0xff]  ;;  %v501_v35 = vld [vmem:[%s2128_s12 + $0x58] sm:$0xff]  ;;  %v1384_v36 = vpack.c.bf16 %v595_v33, %v594_v32  ;;  %v596_v38 = vld [vmem:[%s2140_s20 + $0x60] sm:$0xff]  ;;  %s482_s2 = scalar_lea.vmem %s2331_s6, %s1452_s0  ;;  %s1805_s13 = smov [#allocation11]  }
  0xba   : > { %1349 = vmatpush3.bf16.msra.mxu0 %v1348_v13  ;;  %1374 = vmatprep.subr.bf16.mxu1 %v1801_v0  ;;  %v1360_v37 = vpack.c.bf16 %v501_v35, %v500_v34  ;;  %v597_v39 = vld [vmem:[%s2140_s20 + $0x68] sm:$0xff]  ;;  %v502_v40 = vld [vmem:[%s2128_s12 + $0x60] sm:$0xff]  ;;  %v598_v44 = vld [vmem:[%s2140_s20 + $0x70] sm:$0xff]  ;;  %s1704_s8 = sshll.u32 %s1805_s13, 4  ;;  %s1705_s8 = int_to_ptr.vmem [resolvable:$false] %s1704_s8 }
  0xbb   : > { %1350 = vmatprep.subr.bf16.mxu0 %v1801_v0  ;;  %v503_v41 = vld [vmem:[%s2128_s12 + $0x68] sm:$0xff]  ;;  %v1387_v42 = vpack.c.bf16 %v597_v39, %v596_v38  ;;  %v599_v45 = vld [vmem:[%s2140_s20 + $0x78] sm:$0xff]  ;;  %v504_v46 = vld [vmem:[%s2128_s12 + $0x70] sm:$0xff]  ;;  %s1706_s19 = scalar_lea.vmem %s1705_s8, 2304  ;;  %p1707_p8 = scmp.lt.s32.totalorder %s2271_s14, %s1705_s8 }
  0xbc   : > { %v1363_v43 = vpack.c.bf16 %v503_v41, %v502_v40  ;;  %v505_v47 = vld [vmem:[%s2128_s12 + $0x78] sm:$0xff]  ;;  %v722_v48 = vld [vmem:[%s2187_s21 + $0x8] sm:$0xff]  ;;  %v725_v49 = vld [vmem:[%s2187_s21 + $0x20] sm:$0xff]  ;;  %v1390_v50 = vpack.c.bf16 %v599_v45, %v598_v44  ;;  %s2364_s12 = smov %s2363_s27  ;;  %s2276_s20 = scalar_lea.hbm %s2363_s27, %s1453_s10 }
  0xbd   : > { %1376 = vmatpush3.bf16.msra.mxu1 %v1375_v18  ;;  %v1366_v51 = vpack.c.bf16 %v505_v47, %v504_v46  ;;  %v723_v52 = vld [vmem:[%s2187_s21 + $0x10] sm:$0xff]  ;;  %v726_v53 = vld [vmem:[%s2187_s21 + $0x28] sm:$0xff]  ;;  %v1392_v54 = vpack.c.bf16 %v725_v49, %v722_v48  ;;  %v721_v55 = vld [vmem:[%s2187_s21] sm:$0xff] }
  0xbe   : > { %1352 = vmatpush3.bf16.msra.mxu0 %v1351_v19  ;;  %1377 = vmatprep.subr.bf16.mxu1 %v1801_v0  ;;  %v724_v56 = vld [vmem:[%s2187_s21 + $0x18] sm:$0xff]  ;;  %v731_v58 = vld [vmem:[%s2187_s21 + $0x50] sm:$0xff]  ;;  %v1425_v60 = vpack.c.bf16 %v726_v53, %v723_v52  ;;  %v729_v63 = vld [vmem:[%s2187_s21 + $0x40] sm:$0xff] }
  0xbf   : > { %1353 = vmatprep.subr.bf16.mxu0 %v1801_v0  ;;  %v728_v57 = vld [vmem:[%s2187_s21 + $0x38] sm:$0xff]  ;;  %v1394_v62 = vpack.c.bf16 %v724_v56, %v721_v55  ;;  %v727_v4 = vld [vmem:[%s2187_s21 + $0x30] sm:$0xff]  ;;  %v730_v5 = vld [vmem:[%s2187_s21 + $0x48] sm:$0xff] }
  0xc0   : > { %v583_v59 = vld [vmem:[#allocation6] sm:$0x7]  ;;  %v489_v61 = vld [vmem:[%s2117_s17] sm:$0xff]  ;;  %v1396_v3 = vpack.c.bf16 %v731_v58, %v728_v57  ;;  %v737_v7 = vld [vmem:[%s2187_s21 + $0x80] sm:$0xff]  ;;  %v1398_v9 = vpack.c.bf16 %v730_v5, %v727_v4 }
  0xc1   : > { %1379 = vmatpush3.bf16.msra.mxu1 %v1378_v24  ;;  %v732_v2 = vld [vmem:[%s2187_s21 + $0x58] sm:$0xff]  ;;  %v734_v6 = vld [vmem:[%s2187_s21 + $0x68] sm:$0xff]  ;;  %v735_v10 = vld [vmem:[%s2187_s21 + $0x70] sm:$0xff] }
  0xc2   : > { %1355 = vmatpush3.bf16.msra.mxu0 %v1354_v25  ;;  %1380 = vmatprep.subr.bf16.mxu1 %v1801_v0  ;;  %v1428_v8 = vpack.c.bf16 %v732_v2, %v729_v63  ;;  %v738_v11 = vld [vmem:[%s2187_s21 + $0x88] sm:$0xff]  ;;  %v1400_v12 = vpack.c.bf16 %v737_v7, %v734_v6  ;;  %v733_v13 = vld [vmem:[%s2187_s21 + $0x60] sm:$0xff]  ;;  %v736_v14 = vld [vmem:[%s2187_s21 + $0x78] sm:$0xff]  ;;  %v674_v2 = vlaneseq }
  0xc3   : > { %1356 = vmatprep.subr.bf16.mxu0 %v1801_v0  ;;  %v740_v15 = vld [vmem:[%s2187_s21 + $0x98] sm:$0xff]  ;;  %v743_v16 = vld [vmem:[%s2187_s21 + $0xb0] sm:$0xff]  ;;  %v1431_v17 = vpack.c.bf16 %v738_v11, %v735_v10  ;;  %v1402_v18 = vpack.c.bf16 %v736_v14, %v733_v13  ;;  %v741_v19 = vld [vmem:[%s2187_s21 + $0xa0] sm:$0xff] }
  0xc4   : > { %v744_v20 = vld [vmem:[%s2187_s21 + $0xb8] sm:$0xff]  ;;  %v1404_v21 = vpack.c.bf16 %v743_v16, %v740_v15  ;;  %v739_v22 = vld [vmem:[%s2187_s21 + $0x90] sm:$0xff]  ;;  %v742_v23 = vld [vmem:[%s2187_s21 + $0xa8] sm:$0xff]  ;;  %v675_v4 = vshrl.u32 %v674_v2, 7 }
  0xc5   : > { %1382 = vmatpush3.bf16.msra.mxu1 %v1381_v30  ;;  %v746_v24 = vld [vmem:[%s2187_s21 + $0xc8] sm:$0xff]  ;;  %v749_v25 = vld [vmem:[%s2187_s21 + $0xe0] sm:$0xff]  ;;  %v1434_v26 = vpack.c.bf16 %v744_v20, %v741_v19  ;;  %v1406_v27 = vpack.c.bf16 %v742_v23, %v739_v22  ;;  %v747_v28 = vld [vmem:[%s2187_s21 + $0xd0] sm:$0xff] }
  0xc6   : > { %1358 = vmatpush3.bf16.msra.mxu0 %v1357_v31  ;;  %1383 = vmatprep.subr.bf16.mxu1 %v1801_v0  ;;  %v750_v29 = vld [vmem:[%s2187_s21 + $0xe8] sm:$0xff]  ;;  %v1408_v30 = vpack.c.bf16 %v749_v25, %v746_v24  ;;  %v745_v31 = vld [vmem:[%s2187_s21 + $0xc0] sm:$0xff]  ;;  %v748_v32 = vld [vmem:[%s2187_s21 + $0xd8] sm:$0xff] }
  0xc7   : > { %1359 = vmatprep.subr.bf16.mxu0 %v1801_v0  ;;  %v752_v33 = vld [vmem:[%s2187_s21 + $0xf8] sm:$0xff]  ;;  %v755_v34 = vld [vmem:[%s2187_s21 + $0x110] sm:$0xff]  ;;  %v1437_v35 = vpack.c.bf16 %v750_v29, %v747_v28  ;;  %v754_v39 = vld [vmem:[%s2187_s21 + $0x108] sm:$0xff]  ;;  %v777_v28 = vsub.s32 1, %v675_v4 }
  0xc8   : > { %v751_v38 = vld [vmem:[%s2187_s21 + $0xf0] sm:$0xff]  ;;  %v753_v40 = vld [vmem:[%s2187_s21 + $0x100] sm:$0xff]  ;;  %v758_v44 = vld [vmem:[%s2187_s21 + $0x128] sm:$0xff] }
  0xc9   : > { %1385 = vmatpush3.bf16.msra.mxu1 %v1384_v36  ;;  %v1410_v36 = vpack.c.bf16 %v748_v32, %v745_v31  ;;  %v1414_v41 = vpack.c.bf16 %v754_v39, %v751_v38  ;;  %v761_v45 = vld [vmem:[%s2187_s21 + $0x140] sm:$0xff]  ;;  %v760_v48 = vld [vmem:[%s2187_s21 + $0x138] sm:$0xff]  ;;  %v759_v49 = vld [vmem:[%s2187_s21 + $0x130] sm:$0xff] }
  0xca   : > { %1361 = vmatpush3.bf16.msra.mxu0 %v1360_v37  ;;  %1386 = vmatprep.subr.bf16.mxu1 %v1801_v0  ;;  %v1412_v37 = vpack.c.bf16 %v755_v34, %v752_v33  ;;  %v1416_v46 = vpack.c.bf16 %v761_v45, %v758_v44  ;;  %v757_v47 = vld [vmem:[%s2187_s21 + $0x120] sm:$0xff]  ;;  %v764_v53 = vld [vmem:[%s2187_s21 + $0x158] sm:$0xff]  ;;  %v763_v56 = vld [vmem:[%s2187_s21 + $0x150] sm:$0xff] }
  0xcb   : > { %1362 = vmatprep.subr.bf16.mxu0 %v1801_v0  ;;  %v766_v57 = vld [vmem:[%s2187_s21 + $0x168] sm:$0xff]  ;;  %v765_v58 = vld [vmem:[%s2187_s21 + $0x160] sm:$0xff] }
  0xcc   : > { %v1174_v6 = vld [vmem:[%s473_s7] ss:$0 sm:$0xff] }
  0xcd   : > { %1388 = vmatpush3.bf16.msra.mxu1 %v1387_v42  ;;  %v756_v42 = vld [vmem:[%s2187_s21 + $0x118] sm:$0xff] }
  0xce   : > { %1364 = vmatpush3.bf16.msra.mxu0 %v1363_v43  ;;  %1389 = vmatprep.subr.bf16.mxu1 %v1801_v0  ;;  %v1440_v43 = vpack.c.bf16 %v756_v42, %v753_v40 }
  0xcf   : > { %1365 = vmatprep.subr.bf16.mxu0 %v1801_v0 }
  0xd1   : > { %1391 = vmatpush3.bf16.msra.mxu1 %v1390_v50  ;;  %v1418_v50 = vpack.c.bf16 %v760_v48, %v757_v47 }
  0xd2   : > { %1367 = vmatpush3.bf16.msra.mxu0 %v1366_v51  ;;  %1424 = vmatprep.subr.bf16.mxu1 %v1801_v0  ;;  %v762_v51 = vld [vmem:[%s2187_s21 + $0x148] sm:$0xff] }
  0xd3   : > { %1393 = vmatprep.subr.bf16.mxu0 %v1392_v54  ;;  %v1443_v52 = vpack.c.bf16 %v762_v51, %v759_v49  ;;  %v767_v54 = vld [vmem:[%s2187_s21 + $0x170] sm:$0xff] }
  0xd4   : > { %1301 = vmatmul.mubr.f32.vlgmr.msra.gmra.mrb[0].mxu1 %v583_v59  ;;  %v1420_v55 = vpack.c.bf16 %v767_v54, %v764_v53  ;;  %v1422_v59 = vpack.c.bf16 %v766_v57, %v763_v56 }
  0xd5   : > { %1266 = vmatmul.mubr.f32.vlgmr.msra.gmra.mrb[0].mxu0 %v489_v61  ;;  %1426 = vmatpush3.bf16.msra.mxu1 %v1425_v60  ;;  %v768_v60 = vld [vmem:[%s2187_s21 + $0x178] sm:$0xff]  ;;  %s1700_s21 = scalar_lea.vmem %s2271_s14, 1152 }
  0xd6   : > { %1395 = vmatpush1.bf16.msra.mxu0 %v1394_v62  ;;  %1427 = vmatprep.subr.bf16.mxu1 %v1801_v0  ;;  %v1446_v61 = vpack.c.bf16 %v768_v60, %v765_v58  ;;  %v1804_v62 = vmov 1966171168   ;;  %p1701_p6 = scmp.ne.s32.totalorder %s2271_s14, %s1700_s21  ;;  %p1708_p12 = scmp.lt.s32.totalorder %s1706_s19, %s1700_s21 }
  0xd7   : > { %1397 = vmatprep.subr.bf16.mxu0 %v1396_v3  ;;  %850 = vmatprep.mubr.f32.mxu0 %v1803_v1  ;;  %v672_v63 = vunpack.c.l.s4 %v1804_v62 }
  0xd8   : > { %1335 = vmatprep.mubr.msk.f32.mxu1 %vm1802_vm0, %v1803_v1  ;;  %p1702_p7 = pnand %p1701_p6, %p2365_p5  ;;  %p1709_p13 = por %p1708_p12, %p1707_p8 }
  0xd9   : > { %1429 = vmatpush3.bf16.msra.mxu1 %v1428_v8  ;;  %v673_v3 = vunpack.c.0.s8 %v672_v63  ;;  %v696_v8 = vsub.s32 0, %v675_v4 }
  0xda   : > { %1399 = vmatpush1.bf16.msra.mxu0 %v1398_v9  ;;  %1430 = vmatprep.subr.bf16.mxu1 %v1801_v0  ;;  %p1703_p1 = pneg %p1702_p7 }
  0xdb   : > { %1401 = vmatprep.subr.bf16.mxu0 %v1400_v12  ;;  %v676_v5 = vsub.s32 %v673_v3, %v675_v4 }
  0xdc   : > { %p1710_p0 = pnand %p1709_p13, %p1703_p1 }
  0xdd   : > { %1432 = vmatpush3.bf16.msra.mxu1 %v1431_v17 }
  0xde   : > { %1403 = vmatpush1.bf16.msra.mxu0 %v1402_v18  ;;  %1433 = vmatprep.subr.bf16.mxu1 %v1801_v0 }
  0xdf   : > { %1405 = vmatprep.subr.bf16.mxu0 %v1404_v21 }
  0xe1   : > { %1435 = vmatpush3.bf16.msra.mxu1 %v1434_v26  ;;  %v781_v26 = vsub.s32 2, %v675_v4 }
  0xe2   : > { %1407 = vmatpush1.bf16.msra.mxu0 %v1406_v27  ;;  %1436 = vmatprep.subr.bf16.mxu1 %v1801_v0  ;;  %v769_v27 = vld [vmem:[%s482_s2] sm:$0x7] }
  0xe3   : > { %1409 = vmatprep.subr.bf16.mxu0 %v1408_v30  ;;  %v774_v29 = vrot.slane %v769_v27, %v696_v8  ;;  %v782_v30 = vrot.slane %v769_v27, %v781_v26  ;;  %v778_v31 = vrot.slane %v769_v27, %v777_v28 }
  0xe5   : > { %1438 = vmatpush3.bf16.msra.mxu1 %v1437_v35 }
  0xe6   : > { %1411 = vmatpush1.bf16.msra.mxu0 %v1410_v36  ;;  %1439 = vmatprep.subr.bf16.mxu1 %v1801_v0 }
  0xe7   : > { %1413 = vmatprep.subr.bf16.mxu0 %v1412_v37 }
  0xe9   : > { %1441 = vmatpush3.bf16.msra.mxu1 %v1440_v43 }
  0xea   : > { %1415 = vmatpush1.bf16.msra.mxu0 %v1414_v41  ;;  %1442 = vmatprep.subr.bf16.mxu1 %v1801_v0 }
  0xeb   : > { %1417 = vmatprep.subr.bf16.mxu0 %v1416_v46 }
  0xed   : > { %1444 = vmatpush3.bf16.msra.mxu1 %v1443_v52 }
  0xee   : > { %1419 = vmatpush1.bf16.msra.mxu0 %v1418_v50  ;;  %1445 = vmatprep.subr.bf16.mxu1 %v1801_v0 }
  0xef   : > { %1421 = vmatprep.subr.bf16.mxu0 %v1420_v55 }
  0xf1   : > { %1447 = vmatpush3.bf16.msra.mxu1 %v1446_v61 }
  0xf2   : > { %1423 = vmatpush1.bf16.msra.mxu0 %v1422_v59 }
 0x1a7   : > { %v666_v0 = vpop.f32.mrb[0].mxu1 }
 0x1a8   : > { %v677_v7 = vrot.slane %v666_v0, %v676_v5  ;;  %v1302_v9 = vpop.f32.mrb[1].mxu1  ;;  %v579_v10 = vpop.f32.mrb[0].mxu0 }
 0x1a9   : > { %v1267_v11 = vpop.f32.mrb[1].mxu0  ;;  %v580_v14 = vadd.f32 %v1174_v6, %v579_v10 }
 0x1aa   : > { %v678_v12 = vcombine.high %v677_v7, %v677_v7  ;;  %v685_v13 = vrot.slane %v677_v7, %v676_v5 }
 0x1ac   : > { %v692_v15 = vrot.slane %v678_v12, %v676_v5  ;;  %v693_v16 = vcombine.high %v685_v13, %v685_v13  ;;  %v697_v17 = vrot.slane %v685_v13, %v696_v8 }
 0x1ae   : > { %v709_v18 = vadd.f32 %v697_v17, %v580_v14  ;;  %v701_v19 = vrot.slane %v692_v15, %v696_v8  ;;  %v705_v20 = vrot.slane %v693_v16, %v696_v8 }
 0x1b0   : > { %v712_v21 = vmax.f32 %v709_v18, 0.0  ;;  %v710_v22 = vadd.f32 %v701_v19, %v580_v14  ;;  %v711_v23 = vadd.f32 %v705_v20, %v580_v14 }
 0x1b2   : > { %851 = vmatmul.mubr.f32.vlgmr.msra.gmra.mrb[2].mxu0 %v712_v21  ;;  %1336 = vmatmul.mubr.f32.vlgmr.msra.gmra.mrb[2].mxu1 %v712_v21  ;;  %v713_v24 = vmax.f32 %v710_v22, 0.0  ;;  %v714_v25 = vmax.f32 %v711_v23, 0.0 }
 0x1b3   : > { %856 = vmatprep.mubr.f32.mxu0 %v1803_v1  ;;  %1338 = vmatprep.mubr.msk.f32.mxu1 %vm1802_vm0, %v1803_v1 }
 0x1b6   : > { %857 = vmatmul.mubr.f32.gmra.mrb[4].mxu0 %v713_v24  ;;  %1339 = vmatmul.mubr.f32.gmra.mrb[4].mxu1 %v713_v24 }
 0x1b7   : > { %862 = vmatprep.mubr.f32.mxu0 %v1803_v1  ;;  %1341 = vmatprep.mubr.msk.f32.mxu1 %vm1802_vm0, %v1803_v1 }
 0x1ba   : > { %863 = vmatmul.mubr.f32.gmra.mrb[6].mxu0 %v714_v25  ;;  %1342 = vmatmul.mubr.f32.gmra.mrb[6].mxu1 %v714_v25 }
 0x285   : > { %v852_v32 = vpop.f32.mrb[2].mxu0  ;;  %v935_v33 = vpop.f32.mrb[2].mxu1 }
 0x286   : > { %v853_v34 = vadd.f32 %v852_v32, %v774_v29  ;;  %v936_v1 = vadd.f32 %v935_v33, %v782_v30  ;;  %v854_v35 = vpop.f32.mrb[3].mxu0  ;;  %v1337_v36 = vpop.f32.mrb[3].mxu1 }
 0x287   : > { %v855_v37 = vadd.f32 %v854_v35, %v778_v31 }
 0x288   : > { %949 = vst [vmem:[%s470_s22] sm:$0xff] %v853_v34  ;;  %951 = vst [vmem:[%s470_s22 + $0x10] sm:$0xff] %v936_v1 }
 0x289   : > { %950 = vst [vmem:[%s470_s22 + $0x8] sm:$0xff] %v855_v37  ;;  %v858_v38 = vpop.f32.mrb[4].mxu0  ;;  %v940_v39 = vpop.f32.mrb[4].mxu1 }
 0x28a   : > { %v859_v40 = vadd.f32 %v858_v38, %v774_v29  ;;  %v941_v41 = vadd.f32 %v940_v39, %v782_v30  ;;  %v860_v42 = vpop.f32.mrb[5].mxu0  ;;  %v1340_v43 = vpop.f32.mrb[5].mxu1 }
 0x28b   : > { %v861_v44 = vadd.f32 %v860_v42, %v778_v31 }
 0x28c   : > { %952 = vst [vmem:[%s470_s22 + $0x18] sm:$0xff] %v859_v40  ;;  %954 = vst [vmem:[%s470_s22 + $0x28] sm:$0xff] %v941_v41 }
 0x28d   : > { %953 = vst [vmem:[%s470_s22 + $0x20] sm:$0xff] %v861_v44  ;;  %v864_v45 = vpop.f32.mrb[6].mxu0  ;;  %v945_v46 = vpop.f32.mrb[6].mxu1 }
 0x28e   : > { %v865_v47 = vadd.f32 %v864_v45, %v774_v29  ;;  %v946_v48 = vadd.f32 %v945_v46, %v782_v30  ;;  %v866_v49 = vpop.f32.mrb[7].mxu0  ;;  %v1343_v50 = vpop.f32.mrb[7].mxu1 }
 0x28f   : > { %v867_v51 = vadd.f32 %v866_v49, %v778_v31 }
 0x290   : > { %955 = vst [vmem:[%s470_s22 + $0x30] sm:$0xff] %v865_v47  ;;  %957 = vst [vmem:[%s470_s22 + $0x40] sm:$0xff] %v946_v48 }
 0x291   : > { %956 = vst [vmem:[%s470_s22 + $0x38] sm:$0xff] %v867_v51 }
 0x292   : > { %1713 = shalt.err (!%p1710_p0)
}
 0x293   : > { %s1714_s7 = scalar_lea.hbm %s2276_s20, 1152  ;;  %s1718_s18 = scalar_lea.hbm %s2364_s12, 2304 }
 0x294   : > { %p1715_p4 = scmp.ne.s32.totalorder %s2276_s20, %s1714_s7  ;;  %p1719_p10 = scmp.lt.u32.totalorder %s2276_s20, %s2364_s12 }
 0x295   : > { %p1720_p2 = scmp.lt.u32.totalorder %s1718_s18, %s1714_s7  ;;  %p1722_p6 = scmp.lt.u32.totalorder %s1714_s7, %s2276_s20 }
 0x296   : > { %p1716_p9 = pnand %p1715_p4, %p2365_p5 }
 0x297   : > { %p1721_p11 = por %p1720_p2, %p1719_p10 }
 0x298   : > { %p1717_p3 = pneg %p1716_p9 }
 0x299   : > { %p1723_p7 = por %p1722_p6, %p1721_p11 }
 0x29b   : > { %p1724_p1 = pnand %p1723_p7, %p1717_p3 }
 0x29d   : > { %1727 = shalt.err (!%p1724_p1)
}
 0x29e   : > { %s1806_s22 = smov 384   ;;  %s1807_s10 = smov 24  }
 0x29f   : > { %1466 = dma.vmem_to_hbm [thread:$0]  (%p2365_p5), %s2271_s14, 1152, %s2276_s20, %s959_s9, %s1806_s22, %s1806_s22, %s1807_s10  }
 0x2a0 PF: > { %s989_s17 = sand.u32 1, %s1770_s24   ;;  %p2366_p8 = scmp.ne.s32.totalorder %s2355_s23, 0 }
 0x2a1   : > { %p2367_p12 = scmp.ge.s32.totalorder %s1790_s29, 2  ;;  %s990_s30 = scalar_lea.sflag [#allocation5], %s989_s17 }
 0x2a3   : > { %p1486_p13 = pnand %p2367_p12, %p2366_p8 }
 0x2a5   : > { %1765 = dma.done.wait (!%p1486_p13), %s990_s30, 1152  }
 0x2a6   : > { %1767 = vsyncadd (!%p1486_p13), %s990_s30, 4294966144  ;;  %s24_s29 = sadd.s32 1, %s1790_s29   ;;  %s2368_s27 = sld [smem:[#allocation17_spill]] }
 0x2a7   : > { %p21_p0 = scmp.ge.s32.totalorder %s24_s29, 4   ;;  %s2369_s16 = sld [smem:[#allocation16_spill]] }
 0x2a8   : > { %s2370_s24 = smov %s1774_s25  ;;  %s2371_s25 = smov %s1778_s26 }
 0x2a9   :  { %23 = sbr.rel (!%p21_p0) target bundleno = 12 (0xc), region = 140 }
 0x2ac   : > { %s2372_s26 = smov %s2368_s27  ;;  %s2373_s27 = smov %s1786_s28 }
 0x2ad   : > { %s2374_s28 = smov %s2369_s16 }
 0x2b0   :  { %995 = vsyncpa [#allocation4], 1 }
 0x2b1   :  { %997 = vsyncpa [#allocation4 + $0x1], 1 }
 0x2b2   :  { %998 = vsyncpa [#allocation7], 1 }
 0x2b3   :  { %999 = vsyncpa [#allocation5], 1 }
 0x2b4   :  { %1001 = vsyncpa [#allocation5 + $0x1], 1 }

</bundles_post_ra>
